<compile_context>
chip_gen: v7x
topology: tpu7x:2x2x1
jax: 0.10.0
libtpu: 0.0.40
codegen_flags: <defaults>
</compile_context>

<pallas_src>
import jax
import jax.numpy as jnp
from jax.experimental import pallas as pl
from jax.experimental.pallas import tpu as pltpu


def _copy_kernel(src_ref, dst_ref):
    # Pure pass-through: output_data <- attn_data.  No extra VPU work, keeps
    # the single vst slot on v5e free for the store itself.
    dst_ref[...] = src_ref[...]


def _vmem_capacity_bytes() -> int:
    """Physical VMEM per TensorCore (generation-aware), with a safe fallback."""
    try:
        return int(pltpu.get_tpu_info().vmem_capacity_bytes)
    except Exception:
        return 64 << 20  # conservative: v7x per-TC VMEM


def _as_2d_view(x: jax.Array) -> jax.Array:
    """2D view for the copy kernel.  No pad, no slice-back.

    Preference order:
      1. last dim is a multiple of 128  -> merge leading dims (free reshape).
      2. total size is a multiple of 128 -> lane-dense flat view.
      3. ndim >= 2                       -> full-last-dim blocks (masked stores).
      4. 1-D / 0-D ragged                -> single full block.
    """
    n = x.size
    shape = x.shape
    if x.ndim >= 2 and shape[-1] % 128 == 0:
        return jnp.reshape(x, (n // shape[-1], shape[-1]))
    if n % 128 == 0:
        for lanes in (512, 256, 128):
            if n % lanes == 0:
                return jnp.reshape(x, (n // lanes, lanes))
    if x.ndim >= 2:
        return jnp.reshape(x, (n // shape[-1], shape[-1]))
    # TODO(synk): a huge ragged 1-D array lands here as a single full block;
    # fine for this module's shapes, would need an in-kernel masked tail for
    # arbitrarily large ragged 1-D inputs.
    return jnp.reshape(x, (1, n))


def _choose_tiles(rows: int, cols: int, dtype, max_block_bytes: int,
                  split_threshold_bytes: int) -> tuple[int, int]:
    """Pick (row_tile, col_tile) obeying the (8,128)-or-full-dim rule."""
    itemsize = jnp.dtype(dtype).itemsize
    sub = max(8, 32 // max(1, itemsize))  # sublane granule: f32->8, bf16->16, i8->32
    total_bytes = rows * cols * itemsize

    # Column tile: full cols unless one `sub`-row slab of full cols already
    # blows the block budget AND cols is 128-divisible (so tiling is legal).
    col_tile = cols
    if cols % 128 == 0 and sub * cols * itemsize > max_block_bytes:
        col_tile = max(128, ((max_block_bytes // (sub * itemsize)) // 128) * 128)

    max_rows = max(1, max_block_bytes // max(1, col_tile * itemsize))
    if rows <= max_rows and (total_bytes <= split_threshold_bytes or rows < 2 * sub):
        # Small array: single block along rows (full dim is always legal).
        row_tile = rows
    else:
        row_tile = min(rows, max_rows)
        if total_bytes > split_threshold_bytes and col_tile == cols:
            # Force >= 2 grid steps so both v7x TensorCores get work.
            row_tile = min(row_tile, pl.cdiv(rows, 2))
        row_tile = max(sub, (row_tile // sub) * sub)
        row_tile = min(row_tile, rows)
    return row_tile, col_tile


def pallas_identity_copy(x: jax.Array, *, max_block_bytes: int | None = None,
                         split_threshold_bytes: int = 2 << 20) -> jax.Array:
    """Materialize a copy of `x` with a tiled, HBM-roofline Pallas kernel."""
    if x.size == 0:
        return x  # nothing to copy
    orig_shape, dtype = x.shape, x.dtype
    n = x.size
    itemsize = jnp.dtype(dtype).itemsize

    vmem_cap = _vmem_capacity_bytes()
    if max_block_bytes is None:
        # 2 input + 2 output double-buffers -> 4 blocks <= vmem_cap/4,
        # comfortably under the vmem_cap/2 limit requested below.
        max_block_bytes = max(128 * 1024, vmem_cap // 16)

    x2d = _as_2d_view(x)
    rows, cols = x2d.shape
    row_tile, col_tile = _choose_tiles(rows, cols, dtype, max_block_bytes,
                                       split_threshold_bytes)
    grid = (pl.cdiv(rows, row_tile), pl.cdiv(cols, col_tile))

    out2d = pl.pallas_call(
        _copy_kernel,
        out_shape=jax.ShapeDtypeStruct((rows, cols), dtype),
        grid=grid,
        in_specs=[pl.BlockSpec((row_tile, col_tile), lambda i, j: (i, j))],
        out_specs=pl.BlockSpec((row_tile, col_tile), lambda i, j: (i, j)),
        compiler_params=pltpu.CompilerParams(
            dimension_semantics=("parallel",) * len(grid),
            vmem_limit_bytes=vmem_cap // 2,
        ),
        cost_estimate=pl.CostEstimate(
            flops=0, transcendentals=0, bytes_accessed=2 * n * itemsize),
    )(x2d)

    return jnp.reshape(out2d, orig_shape)


def empty_layer_forward(x: dict, *, materialize: bool = False) -> dict:
    """JAX equivalent of empty_layer.forward.

    Default path aliases attn_data (exact PyTorch semantics, zero HBM
    traffic).  materialize=True forces a physically distinct copy via the
    Pallas kernel.
    """
    attn = x["attn_data"]
    if materialize:
        x["output_data"] = pallas_identity_copy(attn)
    else:
        x["output_data"] = attn  # alias: exactly what the PyTorch module does
    return x


if __name__ == "__main__":
    key = jax.random.PRNGKey(0)
    B, S, H = 2, 8, 32  # small batch / seq / hidden
    attn_data = jax.random.normal(key, (B, S, H), dtype=jnp.float32)
    inputs = {"attn_data": attn_data}

    # Primary path: alias (faithful to the reference module).
    result = empty_layer_forward(dict(inputs))
    jax.block_until_ready(result["output_data"])
    assert result["output_data"].shape == attn_data.shape
    assert result["output_data"].dtype == attn_data.dtype
    assert bool(jnp.all(result["output_data"] == attn_data))
    assert bool(jnp.all(result["attn_data"] == attn_data))

    # Pallas copy kernel on the module's shapes (lane-dense flat view).
    result_copy = empty_layer_forward(dict(inputs), materialize=True)
    jax.block_until_ready(result_copy["output_data"])
    assert result_copy["output_data"].shape == attn_data.shape
    assert result_copy["output_data"].dtype == attn_data.dtype
    assert bool(jnp.all(result_copy["output_data"] == attn_data))

    # Tiled path with a non-divisible boundary block: rows=20, 8-row blocks
    # -> grid=(3, 1), last block masked by Pallas (no pad / slice wrapper).
    y = jax.random.normal(jax.random.PRNGKey(1), (20, 256), dtype=jnp.float32)
    y_copy = pallas_identity_copy(y, max_block_bytes=8 * 256 * 4,
                                  split_threshold_bytes=0)
    jax.block_until_ready(y_copy)
    assert y_copy.shape == y.shape and y_copy.dtype == y.dtype
    assert bool(jnp.all(y_copy == y))

    # Fully ragged shape (neither last dim nor total size % 128 == 0):
    # full-last-dim single block path.
    z = jax.random.normal(jax.random.PRNGKey(2), (3, 5, 7), dtype=jnp.float32)
    z_copy = pallas_identity_copy(z)
    jax.block_until_ready(z_copy)
    assert bool(jnp.all(z_copy == z))

    print("KERNEL_OK")
</pallas_src>

<mosaic_0001>
module attributes {stable_mosaic.version = 11 : i64} {
  func.func @_copy_kernel(%arg0: i32, %arg1: i32, %arg2: memref<1x512xf32, #tpu.memory_space<vmem>>, %arg3: memref<1x512xf32, #tpu.memory_space<vmem>>) attributes {dimension_semantics = [#tpu.dimension_semantics<parallel>, #tpu.dimension_semantics<parallel>], iteration_bounds = array<i64: 1, 1>, scalar_prefetch = 0 : i64, scratch_operands = 0 : i64, tpu.core_type = #tpu.core_type<tc>, window_params = [{transform_indices = @transform_0, window_bounds = array<i64: 1, 512>}, {transform_indices = @transform_1, window_bounds = array<i64: 1, 512>}]} {
    %c0 = arith.constant 0 : index
    %c0_0 = arith.constant 0 : index
    %0 = vector.load %arg2[%c0, %c0_0] : memref<1x512xf32, #tpu.memory_space<vmem>>, vector<1x512xf32>
    %c0_1 = arith.constant 0 : index
    %c0_2 = arith.constant 0 : index
    %1 = vector.load %arg3[%c0_1, %c0_2] : memref<1x512xf32, #tpu.memory_space<vmem>>, vector<1x512xf32>
    tpu.vector_store %arg3[%c0_1, %c0_2], %0 {strides = array<i32>} : memref<1x512xf32, #tpu.memory_space<vmem>>, vector<1x512xf32>,
    return
  }
  func.func @transform_0(%arg0: i32, %arg1: i32) -> (i32, i32) {
    %c0_i32 = arith.constant 0 : i32
    return %arg0, %arg1 : i32, i32
  }
  func.func @transform_1(%arg0: i32, %arg1: i32) -> (i32, i32) {
    %c0_i32 = arith.constant 0 : i32
    return %arg0, %arg1 : i32, i32
  }
}

</mosaic_0001>

<bundles_post_ra>
// kernel: tpu_custom_call.1
= control target key start
LH: loop header
LB: loop body
LE: loop exit
PB: predicated region body
PF: predicated region fallthrough
CT: control target
= control target key end

     0   :  { %6 = vsyncpa [#allocation3], 0  ;;  %s128_s0 = inlined_call_operand.hbm [shape: f32[1,512], index: 0, kind: input, shape index: {}]   ;;  %s129_s1 = inlined_call_operand.hbm [shape: f32[1,512], index: 1, kind: output, shape index: {}]  }
   0x1   :  { %7 = vsyncpa [#allocation4], 0  ;;  %s92_s6 = smov [#allocation2]   ;;  %s44_s10 = scalar_lea.hbm %s128_s0, 64 }
   0x2   :  { %s14_s7 = sshll.u32 %s92_s6, 4  ;;  %p45_p0 = scmp.ne.s32.totalorder %s128_s0, %s44_s10  ;;  %s15_s7 = int_to_ptr.vmem [resolvable:$true] %s14_s7 }
   0x3   :  { %p48_p1 = scmp.lt.u32.totalorder %s44_s10, %s128_s0 }
   0x5   :  { %p50_p2 = pnand %p48_p1, %p45_p0 }
   0x7   :  { %53 = shalt.err (!%p50_p2)
}
   0x8   :  { %s54_s15 = scalar_lea.vmem %s15_s7, 64  ;;  %p59_p4 = scmp.lt.s32.totalorder %s15_s7, %s15_s7 }
   0x9   :  { %p55_p3 = scmp.ne.s32.totalorder %s15_s7, %s54_s15  ;;  %p60_p5 = scmp.lt.s32.totalorder %s54_s15, %s54_s15 }
   0xb   :  { %p61_p6 = por %p60_p5, %p59_p4 }
   0xd   :  { %p62_p7 = pnand %p61_p6, %p55_p3 }
   0xf   :  { %65 = shalt.err (!%p62_p7)
}
  0x10   :  { %17 = dma.hbm_to_vmem [thread:$0]  %s128_s0, 64, %s15_s7, [#allocation3]  }
  0x11   :  { %88 = dma.done.wait [#allocation3], 64  }
  0x12   :  { %89 = vsyncadd [#allocation3], 4294967232  ;;  %v22_v0 = vlaneseq  ;;  %s93_s18 = smov [#allocation5]   ;;  %v21_v1 = vld [vmem:[#allocation2] sm:$0xf] }
  0x13   :  { %s33_s19 = sshll.u32 %s93_s18, 4  ;;  %s34_s19 = int_to_ptr.vmem [resolvable:$true] %s33_s19 }
  0x14   :  { %vm24_vm0 = vcmp.lt.s32.totalorder %v22_v0, 512  ;;  %s66_s20 = scalar_lea.vmem %s34_s19, 64  ;;  %p71_p9 = scmp.lt.s32.totalorder %s34_s19, %s34_s19 }
  0x15   :  { %26 = vst.msk [vmem:[#allocation5] sm:$0xf] %vm24_vm0, %v21_v1  ;;  %p67_p8 = scmp.ne.s32.totalorder %s34_s19, %s66_s20  ;;  %p72_p10 = scmp.lt.s32.totalorder %s66_s20, %s66_s20 }
  0x17   :  { %p73_p11 = por %p72_p10, %p71_p9 }
  0x19   :  { %p74_p12 = pnand %p73_p11, %p67_p8 }
  0x1b   :  { %77 = shalt.err (!%p74_p12)
}
  0x1c   :  { %s78_s0 = scalar_lea.hbm %s129_s1, 64 }
  0x1d   :  { %p79_p13 = scmp.ne.s32.totalorder %s129_s1, %s78_s0  ;;  %p82_p0 = scmp.lt.u32.totalorder %s78_s0, %s129_s1 }
  0x1f   :  { %p84_p1 = pnand %p82_p0, %p79_p13 }
  0x21   :  { %87 = shalt.err (!%p84_p1)
}
  0x22   :  { %36 = dma.vmem_to_hbm [thread:$0]  %s34_s19, 64, %s129_s1, [#allocation4]  }
  0x23   :  { %90 = dma.done.wait [#allocation4], 64  }
  0x24   :  { %91 = vsyncadd [#allocation4], 4294967232 }
  0x25   :  { %40 = vsyncpa [#allocation3], 1 }
  0x26   :  { %41 = vsyncpa [#allocation4], 1 }

</bundles_post_ra>
